<compile_context>
chip_gen: v7x
topology: tpu7x:2x2x1
jax: 0.10.0
libtpu: 0.0.40
codegen_flags: <defaults>
</compile_context>

<pallas_src>
from functools import partial

import jax
import jax.numpy as jnp
from jax.experimental import pallas as pl
from jax.experimental.pallas import tpu as pltpu

_LANES = 128
_SUBL = 8
_MAX_BLOCK_ROWS = 8192      # (8192,128) f32 = 4 MiB per input buffer
_SINGLE_MAX_ROWS = 4096     # <= 2 MiB per f32 input: single invocation fast path
_N_SPLIT = 2                # leading "parallel" axis -> both v7x TCs; sequential on v5e/v6e
_VMEM_LIMIT_BYTES = 32 * 1024 * 1024


def _round_up(x, m):
    return ((x + m - 1) // m) * m


def _single_shot_kernel(p_ref, t_ref, o_ref):
    # Whole (rows,128) slab in VMEM; per-lane partial sums, final collapse in XLA epilogue.
    d = p_ref[...].astype(jnp.float32) - t_ref[...].astype(jnp.float32)
    o_ref[...] = jnp.sum(d * d, axis=0, keepdims=True)


def _make_tiled_kernel(block_rows, rows_valid, needs_mask):
    def kernel(p_ref, t_ref, o_ref):
        c = pl.program_id(0)
        t = pl.program_id(1)

        @pl.when(t == 0)
        def _init():
            o_ref[...] = jnp.zeros_like(o_ref)

        d = p_ref[...].astype(jnp.float32) - t_ref[...].astype(jnp.float32)
        sq = d * d
        if needs_mask:
            # Mask rows past the valid extent (ragged last block / clamped surplus blocks).
            blk = c * pl.num_programs(1) + t
            row = blk * block_rows + jax.lax.broadcasted_iota(
                jnp.int32, (block_rows, _LANES), 0)
            sq = jnp.where(row < rows_valid, sq, 0.0)
        # VALU-only accumulation: vreg-wise adds into the resident (8,128) output block;
        # cross-sublane/lane reduction is deferred to the XLA epilogue.
        o_ref[...] += jnp.sum(sq.reshape(block_rows // _SUBL, _SUBL, _LANES), axis=0)

    return kernel


def _sum_sq_diff(pred, target, single_max_rows, max_block_rows):
    """Streaming sum((pred - target)^2) over all elements, f32 accumulation."""
    p = pred.reshape(-1)
    t = target.reshape(-1)
    n = p.shape[0]
    n_bulk = (n // _LANES) * _LANES

    total = jnp.float32(0.0)
    if n_bulk < n:
        # Ragged tail (< 128 elements): tiny, handled in plain XLA; elements are partitioned
        # between tail and kernel so the mean over the original N stays exact.
        dt = p[n_bulk:].astype(jnp.float32) - t[n_bulk:].astype(jnp.float32)
        total = total + jnp.sum(dt * dt)
    if n_bulk == 0:
        return total

    rows = n_bulk // _LANES
    p2 = p[:n_bulk].reshape(rows, _LANES)   # zero-copy reshape when n % 128 == 0
    t2 = t[:n_bulk].reshape(rows, _LANES)

    ncs = _N_SPLIT
    block_rows = min(max_block_rows, _round_up(-(-rows // ncs), _SUBL))

    if rows <= single_max_rows or block_rows >= rows:
        # Small-N fast path: one invocation, no grid machinery / pl.when.
        out = pl.pallas_call(
            _single_shot_kernel,
            out_shape=jax.ShapeDtypeStruct((1, _LANES), jnp.float32),
        )(p2, t2)
        return total + jnp.sum(out)

    # Tiled streaming path (block_rows % 8 == 0 and block_rows < rows guaranteed here).
    tiles_total = -(-rows // block_rows)              # >= 2
    tpc = -(-tiles_total // ncs)                      # tiles per "core" slice
    needs_mask = (ncs * tpc * block_rows != rows)
    if ncs * tpc == tiles_total:
        in_map = lambda c, t: (c * tpc + t, 0)
    else:
        last_blk = tiles_total - 1
        in_map = lambda c, t: (jnp.minimum(c * tpc + t, last_blk), 0)

    out = pl.pallas_call(
        _make_tiled_kernel(block_rows, rows, needs_mask),
        out_shape=jax.ShapeDtypeStruct((ncs * _SUBL, _LANES), jnp.float32),
        grid=(ncs, tpc),
        in_specs=[pl.BlockSpec((block_rows, _LANES), in_map),
                  pl.BlockSpec((block_rows, _LANES), in_map)],
        out_specs=pl.BlockSpec((_SUBL, _LANES), lambda c, t: (c, 0)),
        compiler_params=pltpu.CompilerParams(
            dimension_semantics=("parallel", "arbitrary"),
            vmem_limit_bytes=_VMEM_LIMIT_BYTES),
    )(p2, t2)
    return total + jnp.sum(out)


@partial(jax.jit, static_argnames=("target_budget", "smoothing", "steep", "auto_coef",
                                   "single_max_rows", "max_block_rows"))
def _detector_loss_device(pred, target, cost, cost_coef, *, target_budget, smoothing,
                          steep, auto_coef, single_max_rows, max_block_rows):
    sum_sq = _sum_sq_diff(pred, target, single_max_rows, max_block_rows)
    err = sum_sq / pred.size                      # mean over the original element count

    coef = err if auto_coef else cost_coef        # cost_coef=None -> error of this evaluation

    if target_budget is None:
        budget_coef = jnp.float32(0.0)
    else:
        b = jnp.float32(target_budget)
        s = jnp.float32(smoothing)
        cost = cost.astype(jnp.float32)
        if steep:
            d = s * (cost - b) / b
            budget_coef = jnp.where(d <= 0.0, 2.0 * jax.nn.sigmoid(d), 1.0 + 0.5 * d)
        else:
            d = cost - b
            budget_coef = 2.0 * jax.nn.sigmoid(s * d / b) + jnp.maximum(d, 0.0) / b

    cost_loss = budget_coef * coef
    return err, cost_loss, err + cost_loss


class PallasDetectorLoss:
    """JAX/Pallas port of AbsDetectorLoss (with voxelwise-MSE inference loss)."""

    def __init__(self, *, target_budget, budget_smoothing=10.0, cost_coef=None,
                 steep_budget=True, debug=False,
                 single_max_rows=_SINGLE_MAX_ROWS, max_block_rows=_MAX_BLOCK_ROWS):
        self.target_budget = None if target_budget is None else float(target_budget)
        self.budget_smoothing = float(budget_smoothing)
        self.cost_coef = cost_coef
        self.steep_budget = bool(steep_budget)
        self.debug = debug
        self.sub_losses = {}
        # tiling knobs (exposed for tests / per-chip tuning)
        self._single_max_rows = int(single_max_rows)
        self._max_block_rows = int(max_block_rows)

    def __call__(self, pred, target, cost):
        auto = self.cost_coef is None
        cc = jnp.asarray(0.0 if auto else self.cost_coef, jnp.float32)
        cost = jnp.asarray(cost, jnp.float32)
        err, cost_loss, total = _detector_loss_device(
            pred, target, cost, cc,
            target_budget=self.target_budget,
            smoothing=self.budget_smoothing,
            steep=self.steep_budget,
            auto_coef=auto,
            single_max_rows=self._single_max_rows,
            max_block_rows=self._max_block_rows)
        self.sub_losses = {"error": err, "cost": cost_loss}
        if auto:
            # mirrors _compute_cost_coef: lock the coefficient to the error of this
            # evaluation; kept as a lazy device scalar (no host round-trip on the hot path).
            self.cost_coef = err
        if self.debug:
            print(f"cost {float(cost)}, cost coef {float(jnp.asarray(self.cost_coef))}, "
                  f"error {float(err)}, cost loss {float(cost_loss)}")
        return total


def _reference_loss(pred, target, cost, target_budget, smoothing, cost_coef, steep):
    p = pred.astype(jnp.float32)
    t = target.astype(jnp.float32)
    err = jnp.mean((p - t) ** 2)
    coef = err if cost_coef is None else cost_coef
    if target_budget is None:
        return err, err * 0.0
    if steep:
        d = smoothing * (cost - target_budget) / target_budget
        bc = jnp.where(d <= 0, 2.0 * jax.nn.sigmoid(d), 1.0 + d / 2.0)
    else:
        d = cost - target_budget
        bc = (2.0 * jax.nn.sigmoid(smoothing * d / target_budget)
              + jnp.maximum(d, 0.0) / target_budget)
    return err, bc * coef


if __name__ == "__main__":
    key = jax.random.PRNGKey(0)
    k1, k2, k3, k4 = jax.random.split(key, 4)

    # 1) small tomopt-like voxel grid (z,x,y), N not a multiple of 128:
    #    single-shot kernel + XLA tail; auto cost_coef, steep budget, cost above budget.
    Z, X, Y = 6, 10, 10
    pred = jax.random.uniform(k1, (Z, X, Y), jnp.float32, 0.0, 0.5)
    target = jax.random.uniform(k2, (Z, X, Y), jnp.float32, 0.0, 0.5)
    loss_fn = PallasDetectorLoss(target_budget=100.0, budget_smoothing=10.0,
                                 cost_coef=None, steep_budget=True)
    total = loss_fn(pred, target, 150.0)
    jax.block_until_ready(total)
    ref_err, ref_cost = _reference_loss(pred, target, 150.0, 100.0, 10.0, None, True)
    assert jnp.allclose(total, ref_err + ref_cost, rtol=2e-5, atol=1e-6), (total, ref_err + ref_cost)
    assert jnp.allclose(loss_fn.sub_losses["error"], ref_err, rtol=2e-5, atol=1e-6)
    assert jnp.allclose(loss_fn.sub_losses["cost"], ref_cost, rtol=2e-5, atol=1e-6)

    # 2) second call reuses the now-locked cost_coef (below budget -> sigmoid branch)
    total2 = loss_fn(pred * 1.1, target, 80.0)
    ref_err2, ref_cost2 = _reference_loss(pred * 1.1, target, 80.0, 100.0, 10.0,
                                          float(ref_err), True)
    assert jnp.allclose(total2, ref_err2 + ref_cost2, rtol=2e-5, atol=1e-6), (
        total2, ref_err2 + ref_cost2)

    # 3) fixed coefficient, shallow budget variant
    loss_fn2 = PallasDetectorLoss(target_budget=100.0, budget_smoothing=10.0,
                                  cost_coef=0.3, steep_budget=False)
    total3 = loss_fn2(pred, target, 120.0)
    ref_err3, ref_cost3 = _reference_loss(pred, target, 120.0, 100.0, 10.0, 0.3, False)
    assert jnp.allclose(total3, ref_err3 + ref_cost3, rtol=2e-5, atol=1e-6), (
        total3, ref_err3 + ref_cost3)

    # 4) exercise the tiled / megacore streaming path (parallel split + ragged-block mask +
    #    clamped index_map) at small size by shrinking the fast-path thresholds;
    #    bf16 inputs stay bf16 across the pallas_call boundary.
    pred4 = jax.random.uniform(k3, (24, 128), jnp.float32, 0.0, 0.5).astype(jnp.bfloat16)
    targ4 = jax.random.uniform(k4, (24, 128), jnp.float32, 0.0, 0.5).astype(jnp.bfloat16)
    loss_fn3 = PallasDetectorLoss(target_budget=100.0, budget_smoothing=10.0,
                                  cost_coef=0.5, steep_budget=True,
                                  single_max_rows=4, max_block_rows=8)
    total4 = loss_fn3(pred4, targ4, 150.0)
    ref_err4, ref_cost4 = _reference_loss(pred4, targ4, 150.0, 100.0, 10.0, 0.5, True)
    assert jnp.allclose(total4, ref_err4 + ref_cost4, rtol=1e-4, atol=1e-6), (
        total4, ref_err4 + ref_cost4)

    # 5) no budget: cost component is zero, loss == error
    loss_fn4 = PallasDetectorLoss(target_budget=None, cost_coef=None)
    total5 = loss_fn4(pred, target, 50.0)
    ref_err5 = jnp.mean((pred - target) ** 2)
    assert jnp.allclose(total5, ref_err5, rtol=2e-5, atol=1e-6), (total5, ref_err5)

    jax.block_until_ready(total5)
    print("KERNEL_OK")
</pallas_src>

<mosaic_0001>
module attributes {stable_mosaic.version = 11 : i64} {
  func.func @_single_shot_kernel(%arg0: memref<4x128xf32, #tpu.memory_space<vmem>>, %arg1: memref<4x128xf32, #tpu.memory_space<vmem>>, %arg2: memref<1x128xf32, #tpu.memory_space<vmem>>) attributes {dimension_semantics = [], scalar_prefetch = 0 : i64, scratch_operands = 0 : i64, tpu.core_type = #tpu.core_type<tc>} {
    %c0 = arith.constant 0 : index
    %c0_0 = arith.constant 0 : index
    %0 = vector.load %arg0[%c0, %c0_0] : memref<4x128xf32, #tpu.memory_space<vmem>>, vector<4x128xf32>
    %c0_1 = arith.constant 0 : index
    %c0_2 = arith.constant 0 : index
    %1 = vector.load %arg1[%c0_1, %c0_2] : memref<4x128xf32, #tpu.memory_space<vmem>>, vector<4x128xf32>
    %2 = arith.subf %0, %1 : vector<4x128xf32>
    %3 = arith.mulf %2, %2 : vector<4x128xf32>
    %cst = arith.constant dense<0.000000e+00> : vector<128xf32>
    %4 = vector.multi_reduction <add>, %3, %cst [0] : vector<4x128xf32> to vector<128xf32>
    %5 = vector.shape_cast %4 : vector<128xf32> to vector<1x128xf32>
    %c0_3 = arith.constant 0 : index
    %c0_4 = arith.constant 0 : index
    %6 = vector.load %arg2[%c0_3, %c0_4] : memref<1x128xf32, #tpu.memory_space<vmem>>, vector<1x128xf32>
    tpu.vector_store %arg2[%c0_3, %c0_4], %5 {strides = array<i32>} : memref<1x128xf32, #tpu.memory_space<vmem>>, vector<1x128xf32>,
    return
  }
}

</mosaic_0001>

<bundles_post_ra>
// kernel: _detector_loss_device.1
= control target key start
LH: loop header
LB: loop body
LE: loop exit
PB: predicated region body
PF: predicated region fallthrough
CT: control target
= control target key end

     0   :  { %vm15_vm0 = vcmask 1043456   ;;  %s52_s0 = inlined_call_operand.vmem [shape: f32[4,128], index: 0, kind: input, shape index: {}]   ;;  %s53_s1 = inlined_call_operand.vmem [shape: f32[4,128], index: 1, kind: input, shape index: {}]   ;;  %s54_s2 = inlined_call_operand.vmem [shape: f32[1,128], index: 2, kind: output, shape index: {}]  }
   0x1   :  { %v11_v0 = vld [vmem:[%s52_s0] sm:$0xf] }
   0x2   :  { %v12_v1 = vld [vmem:[%s53_s1] sm:$0xf] }
   0x3   :  { %v13_v2 = vsub.f32 %v11_v0, %v12_v1 }
   0x5   :  { %v14_v3 = vmul.f32 %v13_v2, %v13_v2 }
   0x7   :  { %v16_v4 = vsel %vm15_vm0, %v14_v3, 0.0 }
   0x8   :  { %v17_v5 = vrot.slane %v16_v4, 4 }
   0xa   :  { %v18_v6 = vadd.f32 %v17_v5, %v16_v4 }
   0xc   :  { %v19_v7 = vrot.slane %v18_v6, 2 }
   0xe   :  { %v20_v8 = vadd.f32 %v19_v7, %v18_v6 }
  0x10   :  { %v21_v9 = vrot.slane %v20_v8, 1 }
  0x12   :  { %v22_v10 = vadd.f32 %v21_v9, %v20_v8 }
  0x14   :  { %23 = vst [vmem:[%s54_s2] sm:$0x1] %v22_v10 }

</bundles_post_ra>
